<compile_context>
chip_gen: v6e
topology: v6e:2x2x1
jax: 0.10.0
libtpu: 0.0.40
codegen_flags: <defaults>
</compile_context>

<pallas_src>
import jax
import jax.numpy as jnp
from jax import lax
from jax.experimental import pallas as pl
from jax.experimental.pallas import tpu as pltpu


def basic_block_kernel(x_ref, w1_ref, s1_ref, b1_ref, w2_ref, s2_ref, b2_ref,
                       o_ref):
    """NB images per grid step, all in lane-dense (H, W*C) layout.

    x_ref  : (NB, H, WC)   f32 input (residual add uses it un-quantized)
    w*_ref : (3*WC, WC)    bf16 banded 3x3 conv weights (dy bands, dx offsets)
    s*/b*  : (1, WC)       f32 folded BN scale / bias, tiled along W
    o_ref  : (NB, H, WC)   lane-dense output
    """
    NB, H, WC = x_ref.shape
    x = x_ref[...]                                   # (NB, H, WC) f32
    x_bf = x.astype(jnp.bfloat16)

    # Hoisted zero halo row: built once, reused by both convs (JAX does not
    # CSE broadcast_in_dim, so don't re-create it per conv call).
    zrow = jnp.zeros((NB, 1, WC), jnp.bfloat16)

    def conv3x3(a_bf, w_ref):
        # dy = -1 / 0 / +1 row shifts (zero rows at each image's top/bottom);
        # the dx taps live inside the banded weight, so this IS the im2col.
        up = jnp.concatenate([zrow, a_bf[:, :H - 1]], axis=1)    # row h-1
        dn = jnp.concatenate([a_bf[:, 1:], zrow], axis=1)        # row h+1
        x3 = jnp.concatenate([up, a_bf, dn], axis=-1)            # (NB, H, 3*WC)
        return jnp.dot(x3.reshape(NB * H, 3 * WC), w_ref[...],
                       preferred_element_type=jnp.float32)       # (NB*H, WC)

    # conv1 + BN1 + ReLU   (lane-dense f32 epilogue)
    out1 = jnp.maximum(conv3x3(x_bf, w1_ref) * s1_ref[...] + b1_ref[...], 0.0)
    # conv2 + BN2
    out2 = (conv3x3(out1.reshape(NB, H, WC).astype(jnp.bfloat16), w2_ref)
            * s2_ref[...] + b2_ref[...])
    # residual add with the original f32 x; single lane-dense store.
    res = out2 + x.reshape(NB * H, WC)
    o_ref[...] = res.reshape(NB, H, WC).astype(o_ref.dtype)


def _build_banded_weight(w_oihw, W, C):
    """(Co,Ci,3,3) PyTorch conv weight -> (3*W*C, W*C) bf16 banded matrix.

    B[dy*W*C + w_src*C + ci, w_out*C + co] = w[co, ci, dy, dx]
        with dx = w_src - w_out + 1; zero outside the |w_src - w_out| <= 1 band.
    """
    w_hwio = jnp.transpose(w_oihw, (2, 3, 1, 0)).astype(jnp.float32)  # (3,3,Ci,Co)
    w_src = jnp.arange(W)[:, None]
    w_out = jnp.arange(W)[None, :]
    diff = w_src - w_out                                     # (W, W)
    valid = (jnp.abs(diff) <= 1).astype(jnp.float32)
    dx_idx = jnp.clip(diff + 1, 0, 2)                        # (W, W)
    band = w_hwio[:, dx_idx, :, :] * valid[None, :, :, None, None]  # (3,W,W,Ci,Co)
    banded = jnp.transpose(band, (0, 1, 3, 2, 4)).reshape(3 * W * C, W * C)
    return banded.astype(jnp.bfloat16)


def _num_tensorcores_per_chip():
    """Best-effort TC-per-chip query for the grid-shape heuristic."""
    try:
        kind = jax.devices()[0].device_kind.lower()
    except Exception:
        return 1
    # v7x exposes 2 TensorCores per chip; v4 / v5p megacore also has 2.
    if "v7" in kind or "v4" in kind or "v5p" in kind:
        return 2
    return 1            # v5e / v6e (single TensorCore)


def basic_block_pallas(x_nhwc, w1_oihw, w2_oihw, s1, b1, s2, b2,
                       out_dtype=jnp.float32):
    """x_nhwc: (N,H,W,C) f32; w*: (Co,Ci,3,3) f32; s*/b*: (1,C) f32 folded BN."""
    N, H, W, C = x_nhwc.shape
    WC = W * C
    assert WC % 128 == 0, "lane-dense layout needs W*C to be a multiple of 128"

    w1 = _build_banded_weight(w1_oihw, W, C)                 # (3*WC, WC) bf16
    w2 = _build_banded_weight(w2_oihw, W, C)
    tile_wc = lambda v: jnp.tile(v.reshape(1, C).astype(jnp.float32), (1, W))
    s1_wc, b1_wc = tile_wc(s1), tile_wc(b1)
    s2_wc, b2_wc = tile_wc(s2), tile_wc(b2)

    x_lane = x_nhwc.reshape(N, H, WC)                        # lane-dense, f32

    # Single-TC chips (v5e/v6e): fold batch into the matmul M dimension.
    # Multi-TC chips (v7x, v4/v5p): one image per TensorCore via the grid.
    if _num_tensorcores_per_chip() >= 2 and N > 1:
        nb, grid, sem = 1, (N,), ("parallel",)
    else:
        nb, grid, sem = N, (1,), ("arbitrary",)

    const2d = pl.BlockSpec((1, WC), lambda n: (0, 0))
    out = pl.pallas_call(
        basic_block_kernel,
        out_shape=jax.ShapeDtypeStruct((N, H, WC), out_dtype),
        grid_spec=pltpu.PrefetchScalarGridSpec(
            num_scalar_prefetch=0,
            grid=grid,
            in_specs=[
                pl.BlockSpec((nb, H, WC), lambda n: (n, 0, 0)),
                pl.BlockSpec((3 * WC, WC), lambda n: (0, 0)),
                const2d, const2d,
                pl.BlockSpec((3 * WC, WC), lambda n: (0, 0)),
                const2d, const2d,
            ],
            out_specs=pl.BlockSpec((nb, H, WC), lambda n: (n, 0, 0)),
        ),
        compiler_params=pltpu.CompilerParams(dimension_semantics=sem),
    )(x_lane, w1, s1_wc, b1_wc, w2, s2_wc, b2_wc)

    return out.reshape(N, H, W, C)


def reference_jax(x_nhwc, w1_oihw, w2_oihw, s1, b1, s2, b2):
    """Pure-JAX reference mirroring the kernel's precision policy
    (bf16 weights/activations into each conv, f32 accumulation & elementwise,
    residual add with the original f32 x)."""
    bfq = lambda a: a.astype(jnp.bfloat16).astype(jnp.float32)
    xq = bfq(x_nhwc)
    k1 = bfq(jnp.transpose(w1_oihw, (2, 3, 1, 0)))   # HWIO
    k2 = bfq(jnp.transpose(w2_oihw, (2, 3, 1, 0)))
    dn = lax.conv_dimension_numbers(xq.shape, k1.shape, ("NHWC", "HWIO", "NHWC"))
    o1 = lax.conv_general_dilated(xq, k1, (1, 1), "SAME", dimension_numbers=dn)
    o1 = jnp.maximum(o1 * s1[0] + b1[0], 0.0)
    o1 = bfq(o1)                                     # kernel feeds conv2 in bf16
    o2 = lax.conv_general_dilated(o1, k2, (1, 1), "SAME", dimension_numbers=dn)
    o2 = o2 * s2[0] + b2[0]
    return o2 + x_nhwc                               # residual with original f32 x


if __name__ == "__main__":
    # BasicBlock(inplanes=8, planes=8, stride=1, downsample=None, pad=1, dilation=1)
    N, C, H, W = 2, 8, 16, 16          # C=8, W=16 -> lane-dense W*C = 128
    key = jax.random.PRNGKey(0)
    k_x, k_w1, k_w2, k_g1, k_b1, k_g2, k_b2, k_m1, k_m2 = jax.random.split(key, 9)

    # Input in NCHW (as the PyTorch module receives), then to NHWC.
    x_nchw = jax.random.normal(k_x, (N, C, H, W), jnp.float32)
    x_nhwc = jnp.transpose(x_nchw, (0, 2, 3, 1))

    # Conv weights in PyTorch layout (Co, Ci, 3, 3).
    w1_oihw = jax.random.normal(k_w1, (C, C, 3, 3), jnp.float32) * 0.1
    w2_oihw = jax.random.normal(k_w2, (C, C, 3, 3), jnp.float32) * 0.1

    # BatchNorm (eval-mode) parameters, folded into per-channel scale/bias.
    eps = 1e-5
    gamma1 = 1.0 + 0.1 * jax.random.normal(k_g1, (C,), jnp.float32)
    beta1 = 0.1 * jax.random.normal(k_b1, (C,), jnp.float32)
    mean1 = 0.1 * jax.random.normal(k_m1, (C,), jnp.float32)
    var1 = jnp.abs(jax.random.normal(k_m2, (C,), jnp.float32)) + 0.5

    gamma2 = 1.0 + 0.1 * jax.random.normal(k_g2, (C,), jnp.float32)
    beta2 = 0.1 * jax.random.normal(k_b2, (C,), jnp.float32)
    mean2 = jnp.linspace(-0.1, 0.1, C, dtype=jnp.float32)
    var2 = jnp.linspace(0.5, 1.5, C, dtype=jnp.float32)

    s1 = (gamma1 / jnp.sqrt(var1 + eps)).reshape(1, C)
    b1 = (beta1 - mean1 * gamma1 / jnp.sqrt(var1 + eps)).reshape(1, C)
    s2 = (gamma2 / jnp.sqrt(var2 + eps)).reshape(1, C)
    b2 = (beta2 - mean2 * gamma2 / jnp.sqrt(var2 + eps)).reshape(1, C)

    out = basic_block_pallas(x_nhwc, w1_oihw, w2_oihw, s1, b1, s2, b2)
    out = jax.block_until_ready(out)

    ref = reference_jax(x_nhwc, w1_oihw, w2_oihw, s1, b1, s2, b2)
    assert out.shape == (N, H, W, C)
    assert jnp.allclose(out, ref, atol=1e-2, rtol=1e-2), "mismatch vs JAX reference"

    print("KERNEL_OK")
</pallas_src>

<mosaic_0001>
module attributes {stable_mosaic.version = 11 : i64} {
  func.func @basic_block_kernel(%arg0: i32, %arg1: memref<2x16x128xf32, #tpu.memory_space<vmem>>, %arg2: memref<384x128xbf16, #tpu.memory_space<vmem>>, %arg3: memref<1x128xf32, #tpu.memory_space<vmem>>, %arg4: memref<1x128xf32, #tpu.memory_space<vmem>>, %arg5: memref<384x128xbf16, #tpu.memory_space<vmem>>, %arg6: memref<1x128xf32, #tpu.memory_space<vmem>>, %arg7: memref<1x128xf32, #tpu.memory_space<vmem>>, %arg8: memref<2x16x128xf32, #tpu.memory_space<vmem>>) attributes {dimension_semantics = [#tpu.dimension_semantics<arbitrary>], iteration_bounds = array<i64: 1>, scalar_prefetch = 0 : i64, scratch_operands = 0 : i64, tpu.core_type = #tpu.core_type<tc>, window_params = [{transform_indices = @transform_0, window_bounds = array<i64: 2, 16, 128>}, {pipeline_mode = #tpu.pipeline_mode<synchronous>, transform_indices = @transform_1, window_bounds = array<i64: 384, 128>}, {pipeline_mode = #tpu.pipeline_mode<synchronous>, transform_indices = @transform_2, window_bounds = array<i64: 1, 128>}, {pipeline_mode = #tpu.pipeline_mode<synchronous>, transform_indices = @transform_3, window_bounds = array<i64: 1, 128>}, {pipeline_mode = #tpu.pipeline_mode<synchronous>, transform_indices = @transform_4, window_bounds = array<i64: 384, 128>}, {pipeline_mode = #tpu.pipeline_mode<synchronous>, transform_indices = @transform_5, window_bounds = array<i64: 1, 128>}, {pipeline_mode = #tpu.pipeline_mode<synchronous>, transform_indices = @transform_6, window_bounds = array<i64: 1, 128>}, {transform_indices = @transform_7, window_bounds = array<i64: 2, 16, 128>}]} {
    %c0 = arith.constant 0 : index
    %c0_0 = arith.constant 0 : index
    %c0_1 = arith.constant 0 : index
    %0 = vector.load %arg1[%c0, %c0_0, %c0_1] : memref<2x16x128xf32, #tpu.memory_space<vmem>>, vector<2x16x128xf32>
    %1 = arith.truncf %0 : vector<2x16x128xf32> to vector<2x16x128xbf16>
    %cst = arith.constant 0.000000e+00 : bf16
    %2 = vector.broadcast %cst : bf16 to vector<2x1x128xbf16>
    %3 = vector.extract_strided_slice %1 {offsets = [0, 0, 0], sizes = [2, 15, 128], strides = [1, 1, 1]} : vector<2x16x128xbf16> to vector<2x15x128xbf16>
    %4 = tpu.concatenate %2, %3 in 1 : vector<2x1x128xbf16>, vector<2x15x128xbf16> -> vector<2x16x128xbf16>
    %5 = vector.extract_strided_slice %1 {offsets = [0, 1, 0], sizes = [2, 15, 128], strides = [1, 1, 1]} : vector<2x16x128xbf16> to vector<2x15x128xbf16>
    %6 = tpu.concatenate %5, %2 in 1 : vector<2x15x128xbf16>, vector<2x1x128xbf16> -> vector<2x16x128xbf16>
    %7 = tpu.concatenate %4, %1, %6 in 2 : vector<2x16x128xbf16>, vector<2x16x128xbf16>, vector<2x16x128xbf16> -> vector<2x16x384xbf16>
    %8 = vector.shape_cast %7 : vector<2x16x384xbf16> to vector<32x384xbf16>
    %c0_2 = arith.constant 0 : index
    %c0_3 = arith.constant 0 : index
    %9 = vector.load %arg2[%c0_2, %c0_3] : memref<384x128xbf16, #tpu.memory_space<vmem>>, vector<384x128xbf16>
    %cst_4 = arith.constant dense<0.000000e+00> : vector<32x128xf32>
    %10 = tpu.matmul %8, %9, %cst_4 {dimension_numbers = #tpu.dot_dimension_numbers<[1], [0], [0], [1], [0, 0, 1, 1], [], []>} : vector<32x384xbf16>, vector<384x128xbf16>, vector<32x128xf32> -> vector<32x128xf32>
    %c0_5 = arith.constant 0 : index
    %c0_6 = arith.constant 0 : index
    %11 = vector.load %arg3[%c0_5, %c0_6] : memref<1x128xf32, #tpu.memory_space<vmem>>, vector<1x128xf32>
    %12 = vector.broadcast %11 : vector<1x128xf32> to vector<32x128xf32>
    %13 = arith.mulf %10, %12 : vector<32x128xf32>
    %c0_7 = arith.constant 0 : index
    %c0_8 = arith.constant 0 : index
    %14 = vector.load %arg4[%c0_7, %c0_8] : memref<1x128xf32, #tpu.memory_space<vmem>>, vector<1x128xf32>
    %15 = vector.broadcast %14 : vector<1x128xf32> to vector<32x128xf32>
    %16 = arith.addf %13, %15 : vector<32x128xf32>
    %cst_9 = arith.constant 0.000000e+00 : f32
    %17 = vector.broadcast %cst_9 : f32 to vector<32x128xf32>
    %18 = arith.maximumf %16, %17 : vector<32x128xf32>
    %19 = vector.shape_cast %18 : vector<32x128xf32> to vector<2x16x128xf32>
    %20 = arith.truncf %19 : vector<2x16x128xf32> to vector<2x16x128xbf16>
    %21 = vector.extract_strided_slice %20 {offsets = [0, 0, 0], sizes = [2, 15, 128], strides = [1, 1, 1]} : vector<2x16x128xbf16> to vector<2x15x128xbf16>
    %22 = tpu.concatenate %2, %21 in 1 : vector<2x1x128xbf16>, vector<2x15x128xbf16> -> vector<2x16x128xbf16>
    %23 = vector.extract_strided_slice %20 {offsets = [0, 1, 0], sizes = [2, 15, 128], strides = [1, 1, 1]} : vector<2x16x128xbf16> to vector<2x15x128xbf16>
    %24 = tpu.concatenate %23, %2 in 1 : vector<2x15x128xbf16>, vector<2x1x128xbf16> -> vector<2x16x128xbf16>
    %25 = tpu.concatenate %22, %20, %24 in 2 : vector<2x16x128xbf16>, vector<2x16x128xbf16>, vector<2x16x128xbf16> -> vector<2x16x384xbf16>
    %26 = vector.shape_cast %25 : vector<2x16x384xbf16> to vector<32x384xbf16>
    %c0_10 = arith.constant 0 : index
    %c0_11 = arith.constant 0 : index
    %27 = vector.load %arg5[%c0_10, %c0_11] : memref<384x128xbf16, #tpu.memory_space<vmem>>, vector<384x128xbf16>
    %cst_12 = arith.constant dense<0.000000e+00> : vector<32x128xf32>
    %28 = tpu.matmul %26, %27, %cst_12 {dimension_numbers = #tpu.dot_dimension_numbers<[1], [0], [0], [1], [0, 0, 1, 1], [], []>} : vector<32x384xbf16>, vector<384x128xbf16>, vector<32x128xf32> -> vector<32x128xf32>
    %c0_13 = arith.constant 0 : index
    %c0_14 = arith.constant 0 : index
    %29 = vector.load %arg6[%c0_13, %c0_14] : memref<1x128xf32, #tpu.memory_space<vmem>>, vector<1x128xf32>
    %30 = vector.broadcast %29 : vector<1x128xf32> to vector<32x128xf32>
    %31 = arith.mulf %28, %30 : vector<32x128xf32>
    %c0_15 = arith.constant 0 : index
    %c0_16 = arith.constant 0 : index
    %32 = vector.load %arg7[%c0_15, %c0_16] : memref<1x128xf32, #tpu.memory_space<vmem>>, vector<1x128xf32>
    %33 = vector.broadcast %32 : vector<1x128xf32> to vector<32x128xf32>
    %34 = arith.addf %31, %33 : vector<32x128xf32>
    %35 = vector.shape_cast %0 : vector<2x16x128xf32> to vector<32x128xf32>
    %36 = arith.addf %34, %35 : vector<32x128xf32>
    %37 = vector.shape_cast %36 : vector<32x128xf32> to vector<2x16x128xf32>
    %c0_17 = arith.constant 0 : index
    %c0_18 = arith.constant 0 : index
    %c0_19 = arith.constant 0 : index
    %38 = vector.load %arg8[%c0_17, %c0_18, %c0_19] : memref<2x16x128xf32, #tpu.memory_space<vmem>>, vector<2x16x128xf32>
    tpu.vector_store %arg8[%c0_17, %c0_18, %c0_19], %37 {strides = array<i32>} : memref<2x16x128xf32, #tpu.memory_space<vmem>>, vector<2x16x128xf32>,
    return
  }
  func.func @transform_0(%arg0: i32) -> (i32, i32, i32) {
    %c0_i32 = arith.constant 0 : i32
    %c0_i32_0 = arith.constant 0 : i32
    %c0_i32_1 = arith.constant 0 : i32
    return %arg0, %c0_i32, %c0_i32_0 : i32, i32, i32
  }
  func.func @transform_1(%arg0: i32) -> (i32, i32) {
    %c0_i32 = arith.constant 0 : i32
    %c0_i32_0 = arith.constant 0 : i32
    %c0_i32_1 = arith.constant 0 : i32
    return %c0_i32, %c0_i32_0 : i32, i32
  }
  func.func @transform_2(%arg0: i32) -> (i32, i32) {
    %c0_i32 = arith.constant 0 : i32
    %c0_i32_0 = arith.constant 0 : i32
    %c0_i32_1 = arith.constant 0 : i32
    return %c0_i32, %c0_i32_0 : i32, i32
  }
  func.func @transform_3(%arg0: i32) -> (i32, i32) {
    %c0_i32 = arith.constant 0 : i32
    %c0_i32_0 = arith.constant 0 : i32
    %c0_i32_1 = arith.constant 0 : i32
    return %c0_i32, %c0_i32_0 : i32, i32
  }
  func.func @transform_4(%arg0: i32) -> (i32, i32) {
    %c0_i32 = arith.constant 0 : i32
    %c0_i32_0 = arith.constant 0 : i32
    %c0_i32_1 = arith.constant 0 : i32
    return %c0_i32, %c0_i32_0 : i32, i32
  }
  func.func @transform_5(%arg0: i32) -> (i32, i32) {
    %c0_i32 = arith.constant 0 : i32
    %c0_i32_0 = arith.constant 0 : i32
    %c0_i32_1 = arith.constant 0 : i32
    return %c0_i32, %c0_i32_0 : i32, i32
  }
  func.func @transform_6(%arg0: i32) -> (i32, i32) {
    %c0_i32 = arith.constant 0 : i32
    %c0_i32_0 = arith.constant 0 : i32
    %c0_i32_1 = arith.constant 0 : i32
    return %c0_i32, %c0_i32_0 : i32, i32
  }
  func.func @transform_7(%arg0: i32) -> (i32, i32, i32) {
    %c0_i32 = arith.constant 0 : i32
    %c0_i32_0 = arith.constant 0 : i32
    %c0_i32_1 = arith.constant 0 : i32
    return %arg0, %c0_i32, %c0_i32_0 : i32, i32, i32
  }
}

</mosaic_0001>

<bundles_post_ra>
// kernel: tpu_custom_call.1
= control target key start
LH: loop header
LB: loop body
LE: loop exit
PB: predicated region body
PF: predicated region fallthrough
CT: control target
= control target key end

     0   :  { %12 = vsyncpa [#allocation3], 0  ;;  %s1220_s0 = inlined_call_operand.hbm [shape: f32[2,16,128], index: 0, kind: input, shape index: {}]   ;;  %s1221_s1 = inlined_call_operand.hbm [shape: bf16[384,128], index: 1, kind: input, shape index: {}]   ;;  %s1222_s2 = inlined_call_operand.vmem [shape: f32[1,128], index: 2, kind: input, shape index: {}]   ;;  %s1223_s3 = inlined_call_operand.vmem [shape: f32[1,128], index: 3, kind: input, shape index: {}]   ;;  %s1224_s4 = inlined_call_operand.hbm [shape: bf16[384,128], index: 4, kind: input, shape index: {}]   ;;  %s1225_s5 = inlined_call_operand.vmem [shape: f32[1,128], index: 5, kind: input, shape index: {}]   ;;  %s1226_s6 = inlined_call_operand.vmem [shape: f32[1,128], index: 6, kind: input, shape index: {}]   ;;  %s1227_s7 = inlined_call_operand.hbm [shape: f32[2,16,128], index: 7, kind: output, shape index: {}]  }
   0x1   :  { %13 = vsyncpa [#allocation6], 0 }
   0x2   :  { %14 = vsyncpa [#allocation4], 0  ;;  %s1099_s24 = smov [#allocation5]  }
   0x3   :  { %s32_s25 = sshll.u32 %s1099_s24, 4  ;;  %s33_s25 = int_to_ptr.vmem [resolvable:$true] %s32_s25 }
   0x4   :  { %s1021_s26 = scalar_lea.vmem %s33_s25, 3072  ;;  %p1026_p1 = scmp.lt.s32.totalorder %s33_s25, %s33_s25 }
   0x5   :  { %p1022_p0 = scmp.ne.s32.totalorder %s33_s25, %s1021_s26  ;;  %p1027_p2 = scmp.lt.s32.totalorder %s1021_s26, %s1021_s26 }
   0x7   :  { %p1028_p3 = por %p1027_p2, %p1026_p1 }
   0x9   :  { %p1029_p4 = pnand %p1028_p3, %p1022_p0 }
   0xb   :  { %1032 = shalt.err (!%p1029_p4)
}
   0xc   :  { %s1100_s27 = smov 64   ;;  %s1101_s28 = smov 4  }
   0xd   :  { %38 = dma.hbm_to_vmem [thread:$0]  %s1221_s1, 3072, %s33_s25, [#allocation6], %s1100_s27, %s1100_s27, %s1101_s28  }
   0xe   :  { %s1102_s8 = smov [#allocation2]  }
   0xf   :  { %s20_s9 = sshll.u32 %s1102_s8, 4  ;;  %s21_s9 = int_to_ptr.vmem [resolvable:$true] %s20_s9 }
  0x10   :  { %s1041_s10 = scalar_lea.vmem %s21_s9, 512  ;;  %p1046_p6 = scmp.lt.s32.totalorder %s21_s9, %s21_s9 }
  0x11   :  { %p1042_p5 = scmp.ne.s32.totalorder %s21_s9, %s1041_s10  ;;  %p1047_p7 = scmp.lt.s32.totalorder %s1041_s10, %s1041_s10 }
  0x13   :  { %p1048_p8 = por %p1047_p7, %p1046_p6 }
  0x15   :  { %p1049_p9 = pnand %p1048_p8, %p1042_p5 }
  0x17   :  { %1052 = shalt.err (!%p1049_p9)
}
  0x18   :  { %s1103_s11 = smov 128   ;;  %s1104_s12 = smov 8  }
  0x19   :  { %26 = dma.hbm_to_vmem [thread:$0]  %s1220_s0, 512, %s21_s9, [#allocation3], %s1103_s11, %s1103_s11, %s1104_s12  }
  0x1a   :  { %s1105_s1 = smov [#allocation7]  }
  0x1b   :  { %s48_s15 = sshll.u32 %s1105_s1, 4  ;;  %s49_s15 = int_to_ptr.vmem [resolvable:$true] %s48_s15 }
  0x1c   :  { %s1061_s16 = scalar_lea.vmem %s49_s15, 3072  ;;  %p1066_p11 = scmp.lt.s32.totalorder %s49_s15, %s49_s15 }
  0x1d   :  { %p1062_p10 = scmp.ne.s32.totalorder %s49_s15, %s1061_s16  ;;  %p1067_p12 = scmp.lt.s32.totalorder %s1061_s16, %s1061_s16 }
  0x1f   :  { %p1068_p13 = por %p1067_p12, %p1066_p11 }
  0x21   :  { %p1069_p0 = pnand %p1068_p13, %p1062_p10 }
  0x23   :  { %1072 = shalt.err (!%p1069_p0)
}
  0x24   :  { %54 = dma.hbm_to_vmem [thread:$0]  %s1224_s4, 3072, %s49_s15, [#allocation6], %s1100_s27, %s1100_s27, %s1101_s28  }
  0x25   :  { %1093 = dma.done.wait [#allocation3], 512  }
  0x26   :  { %1094 = vsyncadd [#allocation3], 4294966784 }
  0x27   :  { %1095 = dma.done.wait [#allocation6], 6144  }
  0x28   :  { %1096 = vsyncadd [#allocation6], 4294961152  ;;  %v965_v0 = vld [vmem:[#allocation5 + $0x78] sm:$0xff]   ;;  %v968_v3 = vld [vmem:[#allocation5 + $0x70] sm:$0xff]   ;;  %vm103_vm0 = vsmask.f32 7424 }
  0x29   :  { %v966_v1 = vld [vmem:[#allocation5 + $0xb8] sm:$0xff]   ;;  %841 = vmatprep.subr.bf16.mxu0 %v965_v0  ;;  %v969_v4 = vld [vmem:[#allocation5 + $0xb0] sm:$0xff]   ;;  %v971_v6 = vld [vmem:[#allocation5 + $0x68] sm:$0xff]   ;;  %vm102_vm1 = vcmask 1047552   ;;  %vm92_vm2 = vsmask.f32 256 }
  0x2a   :  { %v967_v2 = vld [vmem:[#allocation5 + $0x38] sm:$0xff]   ;;  %917 = vmatprep.subr.bf16.mxu1 %v966_v1  ;;  %v970_v5 = vld [vmem:[#allocation5 + $0x30] sm:$0xff]   ;;  %v972_v7 = vld [vmem:[#allocation5 + $0xa8] sm:$0xff]   ;;  %vm91_vm3 = vcmask 1040384  }
  0x2b   :  { %842 = vmatpush3.bf16.msra.mxu0 %v967_v2  ;;  %918 = vmatpush3.bf16.msra.mxu1 %v966_v1  ;;  %v973_v8 = vld [vmem:[#allocation5 + $0x28] sm:$0xff]   ;;  %v974_v9 = vld [vmem:[#allocation5 + $0x60] sm:$0xff]   ;;  %v977_v12 = vld [vmem:[#allocation5 + $0x58] sm:$0xff]  }
  0x2c   :  { %843 = vmatprep.subr.bf16.mxu0 %v968_v3  ;;  %919 = vmatprep.subr.bf16.mxu1 %v969_v4  ;;  %v975_v10 = vld [vmem:[#allocation5 + $0xa0] sm:$0xff]   ;;  %v978_v13 = vld [vmem:[#allocation5 + $0x98] sm:$0xff]   ;;  %v980_v15 = vld [vmem:[#allocation5 + $0x50] sm:$0xff]  }
  0x2d   :  { %v976_v11 = vld [vmem:[#allocation5 + $0x20] sm:$0xff]   ;;  %v979_v14 = vld [vmem:[#allocation5 + $0x18] sm:$0xff]   ;;  %v981_v16 = vld [vmem:[#allocation5 + $0x90] sm:$0xff]  }
  0x2e   :  { %v982_v17 = vld [vmem:[#allocation5 + $0x10] sm:$0xff]   ;;  %v983_v18 = vld [vmem:[#allocation5 + $0x48] sm:$0xff]   ;;  %v986_v21 = vld [vmem:[#allocation5 + $0x40] sm:$0xff]  }
  0x2f   :  { %844 = vmatpush3.bf16.msra.mxu0 %v970_v5  ;;  %920 = vmatpush3.bf16.msra.mxu1 %v969_v4  ;;  %v984_v19 = vld [vmem:[#allocation5 + $0x88] sm:$0xff]   ;;  %v987_v22 = vld [vmem:[#allocation5 + $0x80] sm:$0xff]   ;;  %v1163_v25 = vld [vmem:[#allocation2 + $0x10] sm:$0xff] }
  0x30   :  { %845 = vmatprep.subr.bf16.mxu0 %v971_v6  ;;  %921 = vmatprep.subr.bf16.mxu1 %v972_v7  ;;  %v985_v20 = vld [vmem:[#allocation5 + $0x8] sm:$0xff]   ;;  %v1159_v23 = vld [vmem:[#allocation2] sm:$0xff]  ;;  %v1167_v27 = vld [vmem:[#allocation2 + $0x18] sm:$0xff] }
  0x31   :  { %v1161_v24 = vld [vmem:[#allocation2 + $0x8] sm:$0xff]  ;;  %v74_v28 = vpack.c.bf16 %v1167_v27, %v1163_v25  ;;  %v988_v29 = vld [vmem:[#allocation5] sm:$0xff]   ;;  %vm1173_vm4 = vmand %vm102_vm1, %vm103_vm0 }
  0x32   :  { %v73_v26 = vpack.c.bf16 %v1161_v24, %v1159_v23  ;;  %v989_v37 = vld [vmem:[#allocation7 + $0x78] sm:$0xff]   ;;  %vm1178_vm5 = vmand %vm91_vm3, %vm92_vm2  ;;  %v991_v44 = vld [vmem:[#allocation7 + $0x70] sm:$0xff]  }
  0x33   :  { %846 = vmatpush3.bf16.msra.mxu0 %v973_v8  ;;  %922 = vmatpush3.bf16.msra.mxu1 %v972_v7  ;;  %v83_v32 = vshrl.u32 %v74_v28, 16  ;;  %v86_v33 = vshll.u32 %v74_v28, 16  ;;  %v990_v41 = vld [vmem:[#allocation7 + $0x38] sm:$0xff]   ;;  %v992_v51 = vld [vmem:[#allocation7 + $0x30] sm:$0xff]   ;;  %v993_v52 = vld [vmem:[#allocation7 + $0x68] sm:$0xff]  }
  0x34   :  { %847 = vmatprep.subr.bf16.mxu0 %v974_v9  ;;  %923 = vmatprep.subr.bf16.mxu1 %v975_v10  ;;  %v76_v30 = vshrl.u32 %v73_v26, 16  ;;  %v79_v31 = vshll.u32 %v73_v26, 16  ;;  %v994_v53 = vld [vmem:[#allocation7 + $0xb8] sm:$0xff]   ;;  %v995_v54 = vld [vmem:[#allocation7 + $0x28] sm:$0xff]   ;;  %v996_v55 = vld [vmem:[#allocation7 + $0x60] sm:$0xff]  }
  0x35   :  { %331 = vmatprep.mubr.bf16.mxu0 %v73_v26  ;;  %v98_v39 = vrot.slane %v86_v33, 1  ;;  %v85_v40 = vrot.slane %v83_v32, 7  ;;  %v997_v56 = vld [vmem:[#allocation7 + $0xb0] sm:$0xff]   ;;  %v998_v57 = vld [vmem:[#allocation7 + $0x20] sm:$0xff]   ;;  %v999_v58 = vld [vmem:[#allocation7 + $0x58] sm:$0xff]  }
  0x36   :  { %v96_v34 = vrot.slane %v79_v31, 1  ;;  %v78_v36 = vrot.slane %v76_v30, 7  ;;  %v1000_v59 = vld [vmem:[#allocation7 + $0xa8] sm:$0xff]   ;;  %v1001_v60 = vld [vmem:[#allocation7 + $0x18] sm:$0xff]   ;;  %v1002_v61 = vld [vmem:[#allocation7 + $0x50] sm:$0xff]  }
  0x37   :  { %848 = vmatpush3.bf16.msra.mxu0 %v976_v11  ;;  %924 = vmatpush3.bf16.msra.mxu1 %v975_v10  ;;  %v99_v45 = vor.u32 %v98_v39, %v83_v32  ;;  %v88_v46 = vor.u32 %v86_v33, %v85_v40  ;;  %v1003_v62 = vld [vmem:[#allocation7 + $0xa0] sm:$0xff]   ;;  %v1004_v63 = vld [vmem:[#allocation7 + $0x10] sm:$0xff]   ;;  %v1005_v0 = vld [vmem:[#allocation7 + $0x48] sm:$0xff]  }
  0x38   :  { %849 = vmatprep.subr.bf16.mxu0 %v977_v12  ;;  %925 = vmatprep.subr.bf16.mxu1 %v978_v13  ;;  %v97_v42 = vor.u32 %v96_v34, %v76_v30  ;;  %v81_v43 = vor.u32 %v79_v31, %v78_v36  ;;  %v1006_v1 = vld [vmem:[#allocation7 + $0x98] sm:$0xff]   ;;  %v1007_v2 = vld [vmem:[#allocation7 + $0x8] sm:$0xff]   ;;  %v1008_v3 = vld [vmem:[#allocation7 + $0x40] sm:$0xff]  }
  0x39   :  { %v106_v49 = vsel %vm1173_vm4, %v99_v45, 0  ;;  %v95_v50 = vsel %vm1178_vm5, 0, %v88_v46  ;;  %v1009_v4 = vld [vmem:[#allocation7 + $0x90] sm:$0xff]   ;;  %v1010_v5 = vld [vmem:[#allocation7] sm:$0xff]   ;;  %v1011_v6 = vld [vmem:[#allocation7 + $0x88] sm:$0xff]  }
  0x3a   :  { %v105_v47 = vsel %vm1173_vm4, %v97_v42, 0  ;;  %v94_v48 = vsel %vm1178_vm5, 0, %v81_v43  ;;  %v1012_v7 = vld [vmem:[#allocation7 + $0x80] sm:$0xff]  }
  0x3b   :  { %850 = vmatpush3.bf16.msra.mxu0 %v979_v14  ;;  %926 = vmatpush3.bf16.msra.mxu1 %v978_v13  ;;  %v813_v13 = vld [vmem:[%s1222_s2] ss:$0 sm:$0xff] }
  0x3c   :  { %851 = vmatprep.subr.bf16.mxu0 %v980_v15  ;;  %927 = vmatprep.subr.bf16.mxu1 %v981_v16  ;;  %v840_v35 = vld [vmem:[%s1226_s6] ss:$0 sm:$0xff] }
  0x3d   :  { %933 = vmatprep.mubr.bf16.mxu1 %v105_v47 }
  0x3f   :  { %852 = vmatpush3.bf16.msra.mxu0 %v982_v17  ;;  %928 = vmatpush3.bf16.msra.mxu1 %v981_v16 }
  0x40   :  { %853 = vmatprep.subr.bf16.mxu0 %v983_v18  ;;  %929 = vmatprep.subr.bf16.mxu1 %v984_v19 }
  0x43   :  { %854 = vmatpush3.bf16.msra.mxu0 %v985_v20  ;;  %930 = vmatpush3.bf16.msra.mxu1 %v984_v19  ;;  %v814_v20 = vld [vmem:[%s1223_s3] ss:$0 sm:$0xff] }
  0x44   :  { %855 = vmatprep.subr.bf16.mxu0 %v986_v21  ;;  %931 = vmatprep.subr.bf16.mxu1 %v987_v22 }
  0x47   :  { %856 = vmatpush3.bf16.msra.mxu0 %v988_v29  ;;  %932 = vmatpush3.bf16.msra.mxu1 %v987_v22 }
  0x48   :  { %879 = vmatprep.subr.bf16.mxu0 %v989_v37  ;;  %937 = vmatprep.subr.bf16.mxu1 %v994_v53 }
  0x4a   :  { %332 = vmatmul.mubr.bf16.vlgmr.msra.gmra.mxu0 %v94_v48  ;;  %934 = vmatmul.mubr.bf16.vlgmr.msra.gmra.mxu1 %v106_v49 }
  0x4b   :  { %339 = vmatprep.mubr.bf16.mxu0 %v74_v28  ;;  %880 = vmatpush3.bf16.msra.mxu0 %v990_v41 }
  0x4c   :  { %881 = vmatprep.subr.bf16.mxu0 %v991_v44  ;;  %938 = vmatpush3.bf16.msra.mxu1 %v994_v53 }
  0x4d   :  { %939 = vmatprep.subr.bf16.mxu1 %v997_v56 }
  0x4f   :  { %882 = vmatpush3.bf16.msra.mxu0 %v992_v51 }
  0x50   :  { %883 = vmatprep.subr.bf16.mxu0 %v993_v52  ;;  %940 = vmatpush3.bf16.msra.mxu1 %v997_v56 }
  0x51   :  { %941 = vmatprep.subr.bf16.mxu1 %v1000_v59 }
  0x52   :  { %340 = vmatmul.mubr.bf16.gmra.mxu0 %v95_v50 }
  0x53   :  { %884 = vmatpush3.bf16.msra.mxu0 %v995_v54 }
  0x54   :  { %885 = vmatprep.subr.bf16.mxu0 %v996_v55  ;;  %942 = vmatpush3.bf16.msra.mxu1 %v1000_v59 }
  0x55   :  { %943 = vmatprep.subr.bf16.mxu1 %v1003_v62 }
  0x57   :  { %886 = vmatpush3.bf16.msra.mxu0 %v998_v57 }
  0x58   :  { %887 = vmatprep.subr.bf16.mxu0 %v999_v58  ;;  %944 = vmatpush3.bf16.msra.mxu1 %v1003_v62 }
  0x59   :  { %945 = vmatprep.subr.bf16.mxu1 %v1006_v1 }
  0x5b   :  { %888 = vmatpush3.bf16.msra.mxu0 %v1001_v60 }
  0x5c   :  { %889 = vmatprep.subr.bf16.mxu0 %v1002_v61  ;;  %946 = vmatpush3.bf16.msra.mxu1 %v1006_v1 }
  0x5d   :  { %947 = vmatprep.subr.bf16.mxu1 %v1009_v4 }
  0x5f   :  { %890 = vmatpush3.bf16.msra.mxu0 %v1004_v63 }
  0x60   :  { %891 = vmatprep.subr.bf16.mxu0 %v1005_v0  ;;  %948 = vmatpush3.bf16.msra.mxu1 %v1009_v4 }
  0x61   :  { %949 = vmatprep.subr.bf16.mxu1 %v1011_v6 }
  0x63   :  { %892 = vmatpush3.bf16.msra.mxu0 %v1007_v2 }
  0x64   :  { %893 = vmatprep.subr.bf16.mxu0 %v1008_v3  ;;  %950 = vmatpush3.bf16.msra.mxu1 %v1011_v6 }
  0x65   :  { %951 = vmatprep.subr.bf16.mxu1 %v1012_v7 }
  0x67   :  { %894 = vmatpush3.bf16.msra.mxu0 %v1010_v5 }
  0x68   :  { %952 = vmatpush3.bf16.msra.mxu1 %v1012_v7 }
 0x10a   :  { %v857_v8 = vpop.f32.mrf.mxu0  ;;  %v935_v9 = vpop.f32.mrf.mxu1 }
 0x10c   :  { %v858_v10 = vpop.f32.mrf.mxu0  ;;  %v382_v11 = vpop.f32.mrf.mxu1 }
 0x10d   :  { %v859_v12 = vadd.f32 %v858_v10, %v857_v8  ;;  %v839_v10 = vld [vmem:[%s1225_s5] ss:$0 sm:$0xff]  ;;  %s1106_s5 = smov [#allocation8]  }
 0x10e   :  { %v860_v14 = vpop.f32.mrf.mxu0  ;;  %v936_v15 = vpop.f32.mrf.mxu1  ;;  %s776_s6 = sshll.u32 %s1106_s5, 4  ;;  %s777_s6 = int_to_ptr.vmem [resolvable:$true] %s776_s6 }
 0x10f   :  { %v383_v16 = vadd.f32 %v859_v12, %v382_v11  ;;  %s1073_s23 = scalar_lea.vmem %s777_s6, 512  ;;  %p1078_p2 = scmp.lt.s32.totalorder %s777_s6, %s777_s6 }
 0x110   :  { %v861_v17 = vpop.f32.mrf.mxu0  ;;  %v385_v21 = vpop.f32.mrf.mxu1  ;;  %p1074_p1 = scmp.ne.s32.totalorder %s777_s6, %s1073_s23  ;;  %p1079_p3 = scmp.lt.s32.totalorder %s1073_s23, %s1073_s23 }
 0x111   :  { %v404_v18 = vmul.f32 %v813_v13, %v383_v16  ;;  %v862_v19 = vadd.f32 %v861_v17, %v860_v14 }
 0x112   :  { %v863_v22 = vpop.f32.mrf.mxu0  ;;  %p1080_p4 = por %p1079_p3, %p1078_p2 }
 0x113   :  { %v386_v26 = vadd.f32 %v862_v19, %v385_v21  ;;  %v415_v29 = vadd.f32 %v814_v20, %v404_v18 }
 0x114   :  { %v864_v28 = vpop.f32.mrf.mxu0  ;;  %p1081_p5 = pnand %p1080_p4, %p1074_p1 }
 0x115   :  { %v405_v30 = vmul.f32 %v813_v13, %v386_v26  ;;  %v865_v31 = vadd.f32 %v864_v28, %v863_v22  ;;  %v419_v37 = vmax.f32 %v415_v29, 0.0 }
 0x116   :  { %v866_v32 = vpop.f32.mrf.mxu0 }
 0x117   :  { %v416_v33 = vadd.f32 %v814_v20, %v405_v30  ;;  %v391_v34 = vadd.f32 %v935_v9, %v865_v31 }
 0x118   :  { %v867_v36 = vpop.f32.mrf.mxu0 }
 0x119   :  { %v420_v39 = vmax.f32 %v416_v33, 0.0  ;;  %v406_v40 = vmul.f32 %v813_v13, %v391_v34  ;;  %v868_v41 = vadd.f32 %v867_v36, %v866_v32 }
 0x11b   :  { %v394_v42 = vadd.f32 %v936_v15, %v868_v41  ;;  %v423_v43 = vpack.c.bf16 %v420_v39, %v419_v37  ;;  %v417_v47 = vadd.f32 %v814_v20, %v406_v40 }
 0x11d   :  { %v407_v44 = vmul.f32 %v813_v13, %v394_v42  ;;  %v426_v45 = vshrl.u32 %v423_v43, 16  ;;  %v429_v46 = vshll.u32 %v423_v43, 16  ;;  %675 = vmatprep.mubr.bf16.mxu0 %v423_v43  ;;  %v421_v53 = vmax.f32 %v417_v47, 0.0 }
 0x11f   :  { %v428_v48 = vrot.slane %v426_v45, 7  ;;  %v443_v49 = vrot.slane %v429_v46, 1  ;;  %v418_v50 = vadd.f32 %v814_v20, %v407_v44 }
 0x121   :  { %v431_v51 = vor.u32 %v429_v46, %v428_v48  ;;  %v444_v52 = vor.u32 %v443_v49, %v426_v45  ;;  %v422_v54 = vmax.f32 %v418_v50, 0.0 }
 0x123   :  { %v441_v55 = vsel %vm1178_vm5, 0, %v431_v51  ;;  %v449_v56 = vsel %vm1173_vm4, %v444_v52, 0  ;;  %v424_v57 = vpack.c.bf16 %v422_v54, %v421_v53 }
 0x124   :  { %676 = vmatmul.mubr.bf16.vlgmr.msra.gmra.mxu0 %v441_v55  ;;  %953 = vmatprep.mubr.bf16.mxu1 %v449_v56 }
 0x125   :  { %683 = vmatprep.mubr.bf16.mxu0 %v424_v57  ;;  %v433_v58 = vshrl.u32 %v424_v57, 16  ;;  %v436_v59 = vshll.u32 %v424_v57, 16 }
 0x127   :  { %v435_v60 = vrot.slane %v433_v58, 7  ;;  %v445_v61 = vrot.slane %v436_v59, 1 }
 0x129   :  { %v438_v62 = vor.u32 %v436_v59, %v435_v60  ;;  %v446_v63 = vor.u32 %v445_v61, %v433_v58 }
 0x12b   :  { %v442_v0 = vsel %vm1178_vm5, 0, %v438_v62  ;;  %v450_v1 = vsel %vm1173_vm4, %v446_v63, 0 }
 0x12c   :  { %684 = vmatmul.mubr.bf16.gmra.mxu0 %v442_v0  ;;  %954 = vmatmul.mubr.bf16.vlgmr.msra.gmra.mxu1 %v450_v1 }
 0x1e4   :  { %v895_v2 = vpop.f32.mrf.mxu0 }
 0x1e6   :  { %v896_v3 = vpop.f32.mrf.mxu0 }
 0x1e7   :  { %v897_v8 = vadd.f32 %v896_v3, %v895_v2 }
 0x1e8   :  { %v898_v4 = vpop.f32.mrf.mxu0 }
 0x1ea   :  { %v899_v5 = vpop.f32.mrf.mxu0 }
 0x1eb   :  { %v900_v15 = vadd.f32 %v899_v5, %v898_v4 }
 0x1ec   :  { %v901_v6 = vpop.f32.mrf.mxu0  ;;  %v955_v7 = vpop.f32.mrf.mxu1 }
 0x1ee   :  { %v902_v9 = vpop.f32.mrf.mxu0  ;;  %v726_v11 = vpop.f32.mrf.mxu1 }
 0x1ef   :  { %v903_v38 = vadd.f32 %v902_v9, %v901_v6  ;;  %v727_v12 = vadd.f32 %v897_v8, %v726_v11 }
 0x1f0   :  { %v904_v13 = vpop.f32.mrf.mxu0  ;;  %v956_v14 = vpop.f32.mrf.mxu1 }
 0x1f1   :  { %v735_v16 = vadd.f32 %v955_v7, %v903_v38  ;;  %v748_v17 = vmul.f32 %v839_v10, %v727_v12 }
 0x1f2   :  { %v905_v18 = vpop.f32.mrf.mxu0  ;;  %v729_v19 = vpop.f32.mrf.mxu1 }
 0x1f3   :  { %v750_v20 = vmul.f32 %v839_v10, %v735_v16  ;;  %v759_v21 = vadd.f32 %v840_v35, %v748_v17  ;;  %v906_v22 = vadd.f32 %v905_v18, %v904_v13  ;;  %v730_v26 = vadd.f32 %v900_v15, %v729_v19 }
 0x1f5   :  { %v761_v28 = vadd.f32 %v840_v35, %v750_v20  ;;  %v763_v29 = vadd.f32 %v759_v21, %v1159_v23  ;;  %v738_v30 = vadd.f32 %v956_v14, %v906_v22  ;;  %v749_v31 = vmul.f32 %v839_v10, %v730_v26 }
 0x1f7   :  { %v765_v32 = vadd.f32 %v761_v28, %v1163_v25  ;;  %767 = vst [vmem:[#allocation8] sm:$0xff] %v763_v29  ;;  %v751_v33 = vmul.f32 %v839_v10, %v738_v30  ;;  %v760_v34 = vadd.f32 %v840_v35, %v749_v31 }
 0x1f9   :  { %769 = vst [vmem:[#allocation8 + $0x10] sm:$0xff] %v765_v32  ;;  %v762_v36 = vadd.f32 %v840_v35, %v751_v33  ;;  %v764_v37 = vadd.f32 %v760_v34, %v1161_v24 }
 0x1fb   :  { %v766_v39 = vadd.f32 %v762_v36, %v1167_v27  ;;  %768 = vst [vmem:[#allocation8 + $0x8] sm:$0xff] %v764_v37 }
 0x1fd   :  { %770 = vst [vmem:[#allocation8 + $0x18] sm:$0xff] %v766_v39 }
 0x1fe   :  { %1084 = shalt.err (!%p1081_p5)
}
 0x1ff   :  { %782 = dma.vmem_to_hbm [thread:$0]  %s777_s6, 512, %s1227_s7, [#allocation4], %s1103_s11, %s1103_s11, %s1104_s12  }
 0x200   :  { %1097 = dma.done.wait [#allocation4], 512  }
 0x201   :  { %1098 = vsyncadd [#allocation4], 4294966784 }
 0x202   :  { %786 = vsyncpa [#allocation3], 1 }
 0x203   :  { %787 = vsyncpa [#allocation6], 1 }
 0x204   :  { %788 = vsyncpa [#allocation4], 1 }

</bundles_post_ra>
